<compile_context>
chip_gen: v7x
topology: tpu7x:2x2x1
jax: 0.10.0
libtpu: 0.0.40
codegen_flags: <defaults>
</compile_context>

<pallas_src>
import jax
import jax.numpy as jnp
from jax import lax
from jax.experimental import pallas as pl
from jax.experimental.pallas import tpu as pltpu

_LANE = 128


def _round_up(a: int, m: int) -> int:
    return -(-a // m) * m


def _mlp_kernel(x_ref, w1T_ref, vec_ref, o_ref):
    """One batch tile of Linear(NN,H) -> ReLU -> Linear(H,1) -> Sigmoid.

    x_ref:   (tile, NN) f32  native batch-major block streamed from HBM
    w1T_ref: (H, NN)    f32  hidden1 weight (transposed), VMEM-resident
    vec_ref: (H, 3)     f32  packed [b1 | w2 | b2] columns, VMEM-resident
    o_ref:   (1, tile)  f32  lane-dense output (batch on the 128-lane axis)
    """
    vec = vec_ref[...]
    b1c = vec[:, 0:1]                  # (H, 1) hidden bias
    w2c = vec[:, 1:2]                  # (H, 1) output weight
    b2 = vec[0:1, 2:3]                 # (1, 1) output bias

    # Layer 1 on the MXU: hT[h, b] = sum_k w1[k, h] * x[b, k]  -> (H, tile).
    # Contracting both operands on their last (feature) axis feeds the MXU from
    # the batch-major x block directly: no rank-3 broadcast, no host transpose.
    hT = lax.dot_general(
        w1T_ref[...], x_ref[...],
        dimension_numbers=(((1,), (1,)), ((), ())),
        preferred_element_type=jnp.float32)          # (H, tile)

    hT = jnp.maximum(hT + b1c, 0.0)                  # bias + ReLU, batch on lanes
    # Dropout(p=0.0) == identity (elided).

    # Layer 2 (K=5, N=1) stays on VPU/XLU: 5 lane-wise multiplies + a 5-sublane
    # reduce; result is already lane-dense (1, tile).
    z = jnp.sum(w2c * hT, axis=0, keepdims=True) + b2
    o_ref[...] = jax.nn.sigmoid(z)                   # exp/recip on the EUP


def neural_network_plain(x, w1, b1, w2, b2, *, batch_tile=8192):
    """x: (B, N*N); w1: (N*N, 5); b1: (1, 5); w2: (5, 1); b2: (1, 1) -> (B, 1)."""
    B, NN = x.shape
    H = w1.shape[1]

    # Tiny parameters: transpose w1 (a few hundred bytes) and pack the three
    # small vectors into a single VMEM-resident (H, 3) array.
    w1T = w1.T
    vec = jnp.concatenate(
        [jnp.reshape(b1, (H, 1)),
         jnp.reshape(w2, (H, 1)),
         jnp.broadcast_to(jnp.reshape(b2, (1, 1)), (H, 1))],
        axis=1)

    # x streams in its native (B, NN) layout: no host transpose / no big pad.
    # Only a micro-batch (< one lane tile) is padded up to 128 rows.
    if B < _LANE:
        x_in = jnp.pad(x, ((0, _LANE - B), (0, 0)))
    else:
        x_in = x
    Bk = x_in.shape[0]

    # Batch tile: big enough to amortize per-grid-step overhead, but split so
    # the "parallel" grid has >= 2 steps whenever possible (both v7x TCs busy).
    Bp = _round_up(Bk, _LANE)
    tile = min(_round_up(batch_tile, _LANE),
               max(_LANE, _round_up(Bp // 2, _LANE)))
    grid = (pl.cdiv(Bk, tile),)

    out_T = pl.pallas_call(
        _mlp_kernel,
        out_shape=jax.ShapeDtypeStruct((1, Bk), jnp.float32),
        grid_spec=pltpu.PrefetchScalarGridSpec(
            num_scalar_prefetch=0,
            grid=grid,
            in_specs=[
                pl.BlockSpec((tile, NN), lambda i: (i, 0)),   # x streams over batch
                pl.BlockSpec((H, NN), lambda i: (0, 0)),      # weights stay resident
                pl.BlockSpec((H, 3), lambda i: (0, 0)),       # packed b1|w2|b2
            ],
            out_specs=pl.BlockSpec((1, tile), lambda i: (0, i)),  # lane-dense stores
        ),
        compiler_params=pltpu.CompilerParams(
            dimension_semantics=("parallel",)),
    )(x_in, w1T, vec)

    # (1, Bk) -> (B, 1): slice off micro-batch padding + singleton transpose
    # (both free layout ops in XLA).
    return out_T[:, :B].T


def _xavier_uniform(key, fan_in, fan_out):
    # torch.nn.init.xavier_uniform_: U(-a, a), a = sqrt(6 / (fan_in + fan_out))
    a = jnp.sqrt(6.0 / (fan_in + fan_out))
    return jax.random.uniform(key, (fan_in, fan_out), jnp.float32, -a, a)


def _linear_bias_init(key, fan_in, fan_out):
    # PyTorch default Linear bias init: U(-1/sqrt(fan_in), 1/sqrt(fan_in))
    bound = 1.0 / jnp.sqrt(fan_in)
    return jax.random.uniform(key, (1, fan_out), jnp.float32, -bound, bound)


if __name__ == "__main__":
    N = 4            # Linear input dim is N*N = 16
    B = 8            # small batch
    in_features = N * N

    key = jax.random.PRNGKey(0)
    kx, kw1, kb1, kw2, kb2 = jax.random.split(key, 5)

    x = jax.random.normal(kx, (B, in_features), jnp.float32)
    w1 = _xavier_uniform(kw1, in_features, 5)   # stored as (in, out) = hidden1.weight.T
    b1 = _linear_bias_init(kb1, in_features, 5)
    w2 = _xavier_uniform(kw2, 5, 1)             # stored as (in, out) = output.weight.T
    b2 = _linear_bias_init(kb2, 5, 1)

    out = neural_network_plain(x, w1, b1, w2, b2)
    out = jax.block_until_ready(out)

    # Pure-JAX reference of the same math (high-precision matmuls).
    h_ref = jnp.maximum(jnp.dot(x, w1, precision=lax.Precision.HIGHEST) + b1, 0.0)
    ref = jax.nn.sigmoid(jnp.dot(h_ref, w2, precision=lax.Precision.HIGHEST) + b2)

    assert out.shape == (B, 1)
    assert jnp.allclose(out, ref, atol=1e-3), "mismatch vs reference"

    print("KERNEL_OK")
</pallas_src>

<mosaic_0001>
module attributes {stable_mosaic.version = 11 : i64} {
  func.func @_mlp_kernel(%arg0: i32, %arg1: memref<128x16xf32, #tpu.memory_space<vmem>>, %arg2: memref<5x16xf32, #tpu.memory_space<vmem>>, %arg3: memref<5x3xf32, #tpu.memory_space<vmem>>, %arg4: memref<1x128xf32, #tpu.memory_space<vmem>>) attributes {dimension_semantics = [#tpu.dimension_semantics<parallel>], iteration_bounds = array<i64: 1>, scalar_prefetch = 0 : i64, scratch_operands = 0 : i64, tpu.core_type = #tpu.core_type<tc>, window_params = [{transform_indices = @transform_0, window_bounds = array<i64: 128, 16>}, {pipeline_mode = #tpu.pipeline_mode<synchronous>, transform_indices = @transform_1, window_bounds = array<i64: 5, 16>}, {pipeline_mode = #tpu.pipeline_mode<synchronous>, transform_indices = @transform_2, window_bounds = array<i64: 5, 3>}, {transform_indices = @transform_3, window_bounds = array<i64: 1, 128>}]} {
    %c0 = arith.constant 0 : index
    %c0_0 = arith.constant 0 : index
    %0 = vector.load %arg3[%c0, %c0_0] : memref<5x3xf32, #tpu.memory_space<vmem>>, vector<5x3xf32>
    %1 = vector.extract_strided_slice %0 {offsets = [0, 0], sizes = [5, 1], strides = [1, 1]} : vector<5x3xf32> to vector<5x1xf32>
    %2 = vector.extract_strided_slice %0 {offsets = [0, 1], sizes = [5, 1], strides = [1, 1]} : vector<5x3xf32> to vector<5x1xf32>
    %3 = vector.extract_strided_slice %0 {offsets = [0, 2], sizes = [1, 1], strides = [1, 1]} : vector<5x3xf32> to vector<1x1xf32>
    %c0_1 = arith.constant 0 : index
    %c0_2 = arith.constant 0 : index
    %4 = vector.load %arg2[%c0_1, %c0_2] : memref<5x16xf32, #tpu.memory_space<vmem>>, vector<5x16xf32>
    %c0_3 = arith.constant 0 : index
    %c0_4 = arith.constant 0 : index
    %5 = vector.load %arg1[%c0_3, %c0_4] : memref<128x16xf32, #tpu.memory_space<vmem>>, vector<128x16xf32>
    %cst = arith.constant dense<0.000000e+00> : vector<5x128xf32>
    %6 = tpu.matmul %4, %5, %cst {dimension_numbers = #tpu.dot_dimension_numbers<[1], [1], [0], [0], [0, 0, 1, 0], [], []>} : vector<5x16xf32>, vector<128x16xf32>, vector<5x128xf32> -> vector<5x128xf32>
    %7 = vector.broadcast %1 : vector<5x1xf32> to vector<5x128xf32>
    %8 = arith.addf %6, %7 : vector<5x128xf32>
    %cst_5 = arith.constant 0.000000e+00 : f32
    %9 = vector.broadcast %cst_5 : f32 to vector<5x128xf32>
    %10 = arith.maximumf %8, %9 : vector<5x128xf32>
    %11 = vector.broadcast %2 : vector<5x1xf32> to vector<5x128xf32>
    %12 = arith.mulf %11, %10 : vector<5x128xf32>
    %cst_6 = arith.constant dense<0.000000e+00> : vector<128xf32>
    %13 = vector.multi_reduction <add>, %12, %cst_6 [0] : vector<5x128xf32> to vector<128xf32>
    %14 = vector.shape_cast %13 : vector<128xf32> to vector<1x128xf32>
    %15 = vector.broadcast %3 : vector<1x1xf32> to vector<1x128xf32>
    %16 = arith.addf %14, %15 : vector<1x128xf32>
    %17 = arith.negf %16 : vector<1x128xf32>
    %18 = math.exp %17 : vector<1x128xf32>
    %cst_7 = arith.constant 1.000000e+00 : f32
    %19 = vector.broadcast %cst_7 : f32 to vector<1x128xf32>
    %20 = arith.addf %19, %18 : vector<1x128xf32>
    %21 = arith.divf %19, %20 : vector<1x128xf32>
    %c0_8 = arith.constant 0 : index
    %c0_9 = arith.constant 0 : index
    %22 = vector.load %arg4[%c0_8, %c0_9] : memref<1x128xf32, #tpu.memory_space<vmem>>, vector<1x128xf32>
    tpu.vector_store %arg4[%c0_8, %c0_9], %21 {strides = array<i32>} : memref<1x128xf32, #tpu.memory_space<vmem>>, vector<1x128xf32>,
    return
  }
  func.func @transform_0(%arg0: i32) -> (i32, i32) {
    %c0_i32 = arith.constant 0 : i32
    %c0_i32_0 = arith.constant 0 : i32
    return %arg0, %c0_i32 : i32, i32
  }
  func.func @transform_1(%arg0: i32) -> (i32, i32) {
    %c0_i32 = arith.constant 0 : i32
    %c0_i32_0 = arith.constant 0 : i32
    %c0_i32_1 = arith.constant 0 : i32
    return %c0_i32, %c0_i32_0 : i32, i32
  }
  func.func @transform_2(%arg0: i32) -> (i32, i32) {
    %c0_i32 = arith.constant 0 : i32
    %c0_i32_0 = arith.constant 0 : i32
    %c0_i32_1 = arith.constant 0 : i32
    return %c0_i32, %c0_i32_0 : i32, i32
  }
  func.func @transform_3(%arg0: i32) -> (i32, i32) {
    %c0_i32 = arith.constant 0 : i32
    %c0_i32_0 = arith.constant 0 : i32
    return %c0_i32, %arg0 : i32, i32
  }
}

</mosaic_0001>

<bundles_post_ra>
// kernel: tpu_custom_call.1
= control target key start
LH: loop header
LB: loop body
LE: loop exit
PB: predicated region body
PF: predicated region fallthrough
CT: control target
= control target key end

     0   :  { %vm38_vm0 = vcmask 130048   ;;  %v341_v2 = vmov 0.0|0.0   ;;  %vm342_vm2 = vmmov 0   ;;  %v343_v5 = vmov 0.0   ;;  %s457_s0 = inlined_call_operand.vmem [shape: f32[128,16], index: 0, kind: input, shape index: {}]   ;;  %s458_s1 = inlined_call_operand.vmem [shape: f32[5,16], index: 1, kind: input, shape index: {}]   ;;  %s459_s2 = inlined_call_operand.vmem [shape: f32[5,3], index: 2, kind: input, shape index: {}]   ;;  %s460_s3 = inlined_call_operand.hbm [shape: f32[1,128], index: 3, kind: output, shape index: {}]  }
   0x1   :  { %v17_v0 = vld [vmem:[%s457_s0] sm:$0xff]  ;;  %v18_v1 = vld [vmem:[%s457_s0 + $0x8] sm:$0xff]  ;;  %270 = vmatprep.subr.bf16.mxu0 %v341_v2  ;;  %vm376_vm1 = vmpackc.low %vm38_vm0, %vm38_vm0  ;;  %267 = vmatprep.mubr.msk.f32.mxu0 %vm342_vm2, %v343_v5  ;;  %v344_v6 = vmov 0   ;;  %v345_v7 = vmov 2  }
   0x2   :  { %v271_v3 = vpack.c.bf16 %v18_v1, %v17_v0  ;;  %309 = vset.pattern.permute.xlu0 %v344_v6  ;;  %311 = vset.pattern.permute.xlu1 %v345_v7  ;;  %v19_v8 = vld [vmem:[%s457_s0 + $0x10] sm:$0xff]  ;;  %v20_v9 = vld [vmem:[%s457_s0 + $0x18] sm:$0xff]  ;;  %v15_v10 = vld [vmem:[%s459_s2] sm:$0x1f] }
   0x4   :  { %273 = vmatpush3.bf16.xpose.msk.msra.mxu0 %vm376_vm1, %v271_v3 }
   0x5   :  { %274 = vmatprep.subr.bf16.mxu0 %v341_v2 }
   0x6   :  { %8 = vsyncpa [#allocation3], 0  ;;  %v275_v11 = vpack.c.bf16 %v20_v9, %v19_v8  ;;  %35 = vperm.xlu0 %309, %v15_v10   ;;  %175 = vperm.xlu1 %311, %v15_v10   ;;  %v346_v12 = vmov 1   ;;  %v21_v13 = vld [vmem:[%s457_s0 + $0x20] sm:$0xff]  ;;  %v22_v14 = vld [vmem:[%s457_s0 + $0x28] sm:$0xff]  ;;  %vm166_vm3 = vcmask 1044480  }
   0x7   :  { %v279_v15 = vpack.c.bf16 %v22_v14, %v21_v13  ;;  %v23_v16 = vld [vmem:[%s457_s0 + $0x30] sm:$0xff]  ;;  %v24_v17 = vld [vmem:[%s457_s0 + $0x38] sm:$0xff]  ;;  %v25_v19 = vld [vmem:[%s457_s0 + $0x40] sm:$0xff] }
   0x8   :  { %v283_v18 = vpack.c.bf16 %v24_v17, %v23_v16  ;;  %v26_v20 = vld [vmem:[%s457_s0 + $0x48] sm:$0xff]  ;;  %v27_v22 = vld [vmem:[%s457_s0 + $0x50] sm:$0xff]  ;;  %v28_v23 = vld [vmem:[%s457_s0 + $0x58] sm:$0xff] }
   0x9   :  { %v287_v21 = vpack.c.bf16 %v26_v20, %v25_v19  ;;  %v291_v24 = vpack.c.bf16 %v28_v23, %v27_v22  ;;  %v29_v25 = vld [vmem:[%s457_s0 + $0x60] sm:$0xff]  ;;  %v30_v26 = vld [vmem:[%s457_s0 + $0x68] sm:$0xff]  ;;  %v31_v28 = vld [vmem:[%s457_s0 + $0x70] sm:$0xff] }
   0xa   :  { %310 = vset.pattern.permute.xlu0 %v346_v12  ;;  %v295_v27 = vpack.c.bf16 %v30_v26, %v29_v25  ;;  %v32_v29 = vld [vmem:[%s457_s0 + $0x78] sm:$0xff]  ;;  %v16_v31 = vld [vmem:[%s458_s1] sm:$0x1f]  ;;  %s347_s0 = smov [#allocation2]  }
   0xb   :  { %162 = vperm.xlu0 %310, %v15_v10   ;;  %v299_v30 = vpack.c.bf16 %v32_v29, %v31_v28  ;;  %s192_s1 = sshll.u32 %s347_s0, 4  ;;  %s193_s1 = int_to_ptr.vmem [resolvable:$true] %s192_s1 }
   0xc   :  { %277 = vmatpush3.bf16.xpose.msk.msra.mxu0 %vm376_vm1, %v275_v11  ;;  %s317_s20 = scalar_lea.vmem %s193_s1, 16  ;;  %s321_s21 = scalar_lea.vmem %s193_s1, 32 }
   0xd   :  { %278 = vmatprep.subr.bf16.mxu0 %v341_v2  ;;  %p318_p0 = scmp.ne.s32.totalorder %s193_s1, %s317_s20  ;;  %p322_p1 = scmp.lt.s32.totalorder %s193_s1, %s193_s1 }
   0xe   :  { %p323_p2 = scmp.lt.s32.totalorder %s321_s21, %s317_s20 }
   0xf   :  { %312 = vset.pattern.permute.xlu0 %v345_v7 }
  0x10   :  { %p324_p3 = por %p323_p2, %p322_p1 }
  0x12   :  { %p325_p4 = pnand %p324_p3, %p318_p0 }
  0x14   :  { %281 = vmatpush3.bf16.xpose.msk.msra.mxu0 %vm376_vm1, %v279_v15 }
  0x15   :  { %282 = vmatprep.subr.bf16.mxu0 %v341_v2 }
  0x1c   :  { %285 = vmatpush3.bf16.xpose.msk.msra.mxu0 %vm376_vm1, %v283_v18 }
  0x1d   :  { %286 = vmatprep.subr.bf16.mxu0 %v341_v2 }
  0x24   :  { %289 = vmatpush3.bf16.xpose.msk.msra.mxu0 %vm376_vm1, %v287_v21 }
  0x25   :  { %290 = vmatprep.subr.bf16.mxu0 %v341_v2 }
  0x2c   :  { %293 = vmatpush3.bf16.xpose.msk.msra.mxu0 %vm376_vm1, %v291_v24 }
  0x2d   :  { %294 = vmatprep.subr.bf16.mxu0 %v341_v2 }
  0x34   :  { %297 = vmatpush3.bf16.xpose.msk.msra.mxu0 %vm376_vm1, %v295_v27 }
  0x35   :  { %298 = vmatprep.subr.bf16.mxu0 %v341_v2 }
  0x3c   :  { %301 = vmatpush3.bf16.xpose.msk.msra.mxu0 %vm376_vm1, %v299_v30 }
  0x43   :  { %268 = vmatmul.mubr.msk.f32.vlgmr.msra.gmra.mrb[0].mxu0 %vm38_vm0, %v16_v31 }
  0x85   :  { %v36_v32 = vpop.permute.xlu0 %35  ;;  %v176_v45 = vpop.permute.xlu1 %175 }
  0x8a   :  { %v163_v36 = vpop.permute.xlu0 %162 }
 0x116   :  { %v156_v33 = vpop.f32.mrb[0].mxu0 }
 0x117   :  { %v157_v34 = vadd.f32 %v156_v33, %v36_v32  ;;  %v269_v35 = vpop.f32.mrb[1].mxu0 }
 0x119   :  { %v160_v37 = vmax.f32 %v157_v34, 0.0 }
 0x11b   :  { %v165_v38 = vmul.f32 %v163_v36, %v160_v37 }
 0x11d   :  { %v167_v39 = vsel %vm166_vm3, %v165_v38, 0.0 }
 0x11e   :  { %v168_v40 = vrot.slane %v167_v39, 4 }
 0x120   :  { %v169_v41 = vadd.f32 %v168_v40, %v167_v39 }
 0x122   :  { %v170_v42 = vrot.slane %v169_v41, 2 }
 0x124   :  { %v171_v43 = vadd.f32 %v170_v42, %v169_v41 }
 0x126   :  { %v172_v44 = vrot.slane %v171_v43, 1 }
 0x128   :  { %v173_v46 = vadd.f32 %v172_v44, %v171_v43 }
 0x12a   :  { %v178_v47 = vadd.f32 %v176_v45, %v173_v46 }
 0x12c   :  { %v217_v48 = vmul.f32 -1.442695, %v178_v47 }
 0x12e   :  { %313 = vpow2.f32 %v217_v48 }
 0x138   :  { %v314_v49 = vpop.eup %313 }
 0x139   :  { %v182_v50 = vadd.f32 1.0, %v314_v49 }
 0x13b   :  { %315 = vrcp.f32 %v182_v50 }
 0x145   :  { %v316_v51 = vpop.eup %315 }
 0x146   :  { %185 = vst [vmem:[#allocation2] sm:$0x1] %v316_v51 }
 0x147   :  { %328 = shalt.err (!%p325_p4)
}
 0x148   :  { %s329_s24 = scalar_lea.hbm %s460_s3, 16 }
 0x149   :  { %p330_p5 = scmp.ne.s32.totalorder %s460_s3, %s329_s24  ;;  %p333_p6 = scmp.lt.u32.totalorder %s329_s24, %s460_s3 }
 0x14b   :  { %p335_p7 = pnand %p333_p6, %p330_p5 }
 0x14d   :  { %338 = shalt.err (!%p335_p7)
}
 0x14e   :  { %195 = dma.vmem_to_hbm [thread:$0]  %s193_s1, 16, %s460_s3, [#allocation3]  }
 0x14f   :  { %339 = dma.done.wait [#allocation3], 16  }
 0x150   :  { %340 = vsyncadd [#allocation3], 4294967280 }
 0x151   :  { %199 = vsyncpa [#allocation3], 1 }

</bundles_post_ra>
